<compile_context>
chip_gen: v7x
topology: tpu7x:2x2x1
jax: 0.10.0
libtpu: 0.0.40
codegen_flags: <defaults>
</compile_context>

<pallas_src>
import jax
import jax.numpy as jnp
from jax.experimental import pallas as pl
from jax.experimental.pallas import tpu as pltpu

IN_DIM = 100
H1_DIM = 50
H2_DIM = 25
OUT_DIM = 1

_MAX_TILE_B = 32768   # int8 x-tile 3.2 MB; 2 bufs + f32 out bufs ~= 10.5 MB VMEM
_MIN_TILE_B = 128     # one lane-width; keeps the output lane-dense


def _cdiv(a, b):
    return (a + b - 1) // b


def _round_up(x, m):
    return _cdiv(x, m) * m


def _matvec_kernel(x_ref, w_ref, b_ref, o_ref):
    """One batch tile of the collapsed network, batch on the lane axis.

    x_ref : [IN_DIM, TB] int8  -- streamed (double-buffered) per grid step
    w_ref : [IN_DIM, 1]  f32   -- collapsed weights, resident across the grid
    b_ref : [1]          f32   -- collapsed bias, SMEM scalar
    o_ref : [1, TB]      f32   -- lane-dense output block (batch on lanes)
    """
    x = x_ref[...].astype(jnp.float32)            # VPU cast, hidden under x DMA
    w = w_ref[...]                                # [IN_DIM, 1], broadcast over lanes
    # Sublane-axis reduce: VPU multiply-adds + one short intra-vreg sublane
    # reduce. No cross-lane XLU relayout; result already lane-dense over batch.
    acc = jnp.sum(x * w, axis=0, keepdims=True)   # [1, TB]
    o_ref[...] = acc + b_ref[0]


def to_network_input(board):
    """Net.to_numbers() boundary: board [B, 100] with values in {-1, 0, 1}
    -> int8, batch-on-lane layout [100, B] consumed directly by the kernel.

    In a real pipeline the board encoder / replay buffer should write this
    layout straight to HBM so the cast+transpose below never appears as an
    extra XLA pass over x. NOTE: astype(int8) truncates -- only valid because
    board values are exactly {-1, 0, 1}.
    """
    assert board.shape[-1] == IN_DIM
    return board.astype(jnp.int8).T


def net_forward(x_t, params):
    """x_t: [100, B] int8 (batch on the last/lane axis), values in {-1, 0, 1}.

    Returns [B, 1] float32, numerically equal to
    Linear(100,50) -> Linear(50,25) -> Linear(25,1) applied to x (no activations).
    """
    w1, b1 = params["w1"], params["b1"]
    w2, b2 = params["w2"], params["b2"]
    w3, b3 = params["w3"], params["b3"]

    # Collapse the 3 affine layers into one (tiny host/XLA matmuls, done once).
    w_eff = (w1 @ w2 @ w3).astype(jnp.float32)                                   # [100, 1]
    b_eff = (b1 @ w2 @ w3 + b2 @ w3 + b3).reshape(OUT_DIM).astype(jnp.float32)   # [1]

    if x_t.dtype != jnp.int8:
        x_t = x_t.astype(jnp.int8)   # no-op on the recommended upstream path

    batch = x_t.shape[1]
    # >=2 grid steps once the batch is big enough, so the "parallel" batch axis
    # spans both TensorCores on v7x; cap the tile at _MAX_TILE_B for huge batches.
    num_tiles = max(2 if batch >= 2 * _MIN_TILE_B else 1, _cdiv(batch, _MAX_TILE_B))
    tile_b = _round_up(_cdiv(batch, num_tiles), _MIN_TILE_B)
    padded_b = num_tiles * tile_b
    if padded_b != batch:
        # Padding is at most num_tiles*128 rows (<1% for large batches, ~free in
        # absolute terms for small ones).
        # TODO(synk): have the to_numbers/replay-buffer producer allocate the
        # padded [100, padded_b] buffer upstream so this pad never re-reads x.
        x_t = jnp.pad(x_t, ((0, 0), (0, padded_b - batch)))

    out = pl.pallas_call(
        _matvec_kernel,
        out_shape=jax.ShapeDtypeStruct((1, padded_b), jnp.float32),
        grid=(num_tiles,),
        in_specs=[
            pl.BlockSpec((IN_DIM, tile_b), lambda i: (0, i)),    # stream x columns
            pl.BlockSpec((IN_DIM, 1), lambda i: (0, 0)),         # resident weights
            pl.BlockSpec(memory_space=pltpu.MemorySpace.SMEM),   # scalar bias
        ],
        out_specs=pl.BlockSpec((1, tile_b), lambda i: (0, i)),   # lane-dense output
        compiler_params=pltpu.CompilerParams(
            dimension_semantics=("parallel",),                   # megacore / dual-TC
        ),
    )(x_t, w_eff, b_eff)

    return out[0, :batch].reshape(batch, OUT_DIM)


def init_params(key):
    """Deterministic init matching torch.nn.Linear default (U(-1/sqrt(fan_in), +))."""
    keys = jax.random.split(key, 6)

    def linear_init(kw, kb, fan_in, fan_out):
        bound = 1.0 / jnp.sqrt(jnp.float32(fan_in))
        # stored as [in, out] so forward computes x @ W
        w = jax.random.uniform(kw, (fan_in, fan_out), jnp.float32, -bound, bound)
        b = jax.random.uniform(kb, (1, fan_out), jnp.float32, -bound, bound)
        return w, b

    w1, b1 = linear_init(keys[0], keys[1], IN_DIM, H1_DIM)
    w2, b2 = linear_init(keys[2], keys[3], H1_DIM, H2_DIM)
    w3, b3 = linear_init(keys[4], keys[5], H2_DIM, OUT_DIM)
    return {"w1": w1, "b1": b1, "w2": w2, "b2": b2, "w3": w3, "b3": b3}


def reference_forward(x, params):
    """Pure-JAX 3-layer reference (uncollapsed), f32 throughout."""
    h1 = x @ params["w1"] + params["b1"]
    h2 = h1 @ params["w2"] + params["b2"]
    return h2 @ params["w3"] + params["b3"]


# TODO(synk): Net.to_numbers string parsing, the MSE/Adam training step,
# checkpoint save/load and get_future_max's successor sort are host-side
# Python / training logic with no Pallas equivalent; only forward() is kernelized.

if __name__ == "__main__":
    key = jax.random.PRNGKey(0)
    k_in, k_params = jax.random.split(key)
    params = init_params(k_params)

    # batch=2: single-state style forward; batch=260: training-style mini-batch
    # that exercises the 2-step ("parallel") grid and the pad path.
    for batch in (2, 260):
        board = jax.random.randint(
            jax.random.fold_in(k_in, batch), (batch, IN_DIM),
            minval=-1, maxval=2, dtype=jnp.int32)

        x_t = to_network_input(board)          # int8, [100, B] (upstream layout)
        out = jax.block_until_ready(net_forward(x_t, params))

        ref = reference_forward(board.astype(jnp.float32), params)
        assert out.shape == (batch, OUT_DIM)
        # Collapsed weights + sublane-order reassociate the f32 sums; tolerance
        # covers that rounding for the current weight magnitudes.
        assert jnp.allclose(out, ref, atol=1e-4, rtol=1e-4), (batch, out, ref)

    print("KERNEL_OK")
</pallas_src>

<mosaic_0001>
module attributes {stable_mosaic.version = 11 : i64} {
  func.func @_matvec_kernel(%arg0: i32, %arg1: memref<100x128xi8, #tpu.memory_space<vmem>>, %arg2: memref<100x1xf32, #tpu.memory_space<vmem>>, %arg3: memref<1xf32, #tpu.memory_space<smem>>, %arg4: memref<1x128xf32, #tpu.memory_space<vmem>>) attributes {dimension_semantics = [#tpu.dimension_semantics<parallel>], iteration_bounds = array<i64: 1>, scalar_prefetch = 0 : i64, scratch_operands = 0 : i64, tpu.core_type = #tpu.core_type<tc>, window_params = [{transform_indices = @transform_0, window_bounds = array<i64: 100, 128>}, {pipeline_mode = #tpu.pipeline_mode<synchronous>, transform_indices = @transform_1, window_bounds = array<i64: 100, 1>}, {transform_indices = @transform_2, window_bounds = array<i64: 1>}, {transform_indices = @transform_3, window_bounds = array<i64: 1, 128>}]} {
    %c0 = arith.constant 0 : index
    %c0_0 = arith.constant 0 : index
    %0 = vector.load %arg1[%c0, %c0_0] : memref<100x128xi8, #tpu.memory_space<vmem>>, vector<100x128xi8>
    %1 = arith.sitofp %0 : vector<100x128xi8> to vector<100x128xf32>
    %c0_1 = arith.constant 0 : index
    %c0_2 = arith.constant 0 : index
    %2 = vector.load %arg2[%c0_1, %c0_2] : memref<100x1xf32, #tpu.memory_space<vmem>>, vector<100x1xf32>
    %3 = vector.broadcast %2 : vector<100x1xf32> to vector<100x128xf32>
    %4 = arith.mulf %1, %3 : vector<100x128xf32>
    %cst = arith.constant dense<0.000000e+00> : vector<128xf32>
    %5 = vector.multi_reduction <add>, %4, %cst [0] : vector<100x128xf32> to vector<128xf32>
    %6 = vector.shape_cast %5 : vector<128xf32> to vector<1x128xf32>
    %c0_3 = arith.constant 0 : index
    %7 = memref.load %arg3[%c0_3] : memref<1xf32, #tpu.memory_space<smem>>
    %8 = vector.broadcast %7 : f32 to vector<1x128xf32>
    %9 = arith.addf %6, %8 : vector<1x128xf32>
    %c0_4 = arith.constant 0 : index
    %c0_5 = arith.constant 0 : index
    %10 = vector.load %arg4[%c0_4, %c0_5] : memref<1x128xf32, #tpu.memory_space<vmem>>, vector<1x128xf32>
    tpu.vector_store %arg4[%c0_4, %c0_5], %9 {strides = array<i32>} : memref<1x128xf32, #tpu.memory_space<vmem>>, vector<1x128xf32>,
    return
  }
  func.func @transform_0(%arg0: i32) -> (i32, i32) {
    %c0_i32 = arith.constant 0 : i32
    %c0_i32_0 = arith.constant 0 : i32
    return %c0_i32, %arg0 : i32, i32
  }
  func.func @transform_1(%arg0: i32) -> (i32, i32) {
    %c0_i32 = arith.constant 0 : i32
    %c0_i32_0 = arith.constant 0 : i32
    %c0_i32_1 = arith.constant 0 : i32
    return %c0_i32, %c0_i32_0 : i32, i32
  }
  func.func @transform_2(%arg0: i32) -> i32 {
    %c0_i32 = arith.constant 0 : i32
    %c0_i32_0 = arith.constant 0 : i32
    return %c0_i32 : i32
  }
  func.func @transform_3(%arg0: i32) -> (i32, i32) {
    %c0_i32 = arith.constant 0 : i32
    %c0_i32_0 = arith.constant 0 : i32
    return %c0_i32, %arg0 : i32, i32
  }
}

</mosaic_0001>

<bundles_post_ra>
// kernel: tpu_custom_call.1
= control target key start
LH: loop header
LB: loop body
LE: loop exit
PB: predicated region body
PF: predicated region fallthrough
CT: control target
= control target key end

     0   :  { %v241_v2 = vmov 0   ;;  %s329_s0 = inlined_call_operand.vmem [shape: s8[100,128], index: 0, kind: input, shape index: {}]   ;;  %s330_s1 = inlined_call_operand.vmem [shape: f32[100,1], index: 1, kind: input, shape index: {}]   ;;  %s331_s2 = inlined_call_operand.<no memory space> [shape: f32[1], index: 2, kind: input, shape index: {}]   ;;  %s332_s3 = inlined_call_operand.hbm [shape: f32[1,128], index: 3, kind: output, shape index: {}]  }
   0x1   :  { %v57_v0 = vld [vmem:[%s330_s1 + $0x10] sm:$0xff]  ;;  %v55_v1 = vld [vmem:[%s330_s1] sm:$0xff]  ;;  %216 = vset.pattern.permute.xlu1 %v241_v2  ;;  %215 = vset.pattern.permute.xlu0 %v241_v2  ;;  %v58_v3 = vld [vmem:[%s330_s1 + $0x18] sm:$0xff] }
   0x2   :  { %80 = vperm.xlu1 %216, %v57_v0   ;;  %70 = vperm.xlu0 %215, %v55_v1   ;;  %v56_v4 = vld [vmem:[%s330_s1 + $0x8] sm:$0xff] }
   0x3   :  { %9 = vsyncpa [#allocation4], 0  ;;  %v60_v5 = vld [vmem:[%s330_s1 + $0x28] sm:$0xff]  ;;  %v59_v6 = vld [vmem:[%s330_s1 + $0x20] sm:$0xff]  ;;  %vm157_vm0 = vcmask 1043456   ;;  %s242_s19 = smov [#allocation3]  }
   0x4   :  { %v62_v7 = vld [vmem:[%s330_s1 + $0x38] sm:$0xff]  ;;  %v61_v8 = vld [vmem:[%s330_s1 + $0x30] sm:$0xff]  ;;  %v64_v9 = vld [vmem:[%s330_s1 + $0x48] sm:$0xff]  ;;  %s176_s20 = sshll.u32 %s242_s19, 4  ;;  %s177_s20 = int_to_ptr.vmem [resolvable:$true] %s176_s20 }
   0x5   :  { %v63_v10 = vld [vmem:[%s330_s1 + $0x40] sm:$0xff]  ;;  %v66_v11 = vld [vmem:[%s330_s1 + $0x58] sm:$0xff]  ;;  %v65_v12 = vld [vmem:[%s330_s1 + $0x50] sm:$0xff]  ;;  %s217_s21 = scalar_lea.vmem %s177_s20, 16  ;;  %s221_s22 = scalar_lea.vmem %s177_s20, 32 }
   0x6   :  { %85 = vperm.xlu1 %216, %v58_v3   ;;  %75 = vperm.xlu0 %215, %v56_v4   ;;  %v67_v13 = vld [vmem:[%s330_s1 + $0x60] sm:$0xf]  ;;  %v208_v15 = vld [vmem:[%s329_s0 + $0x4] sm:$0xff]   ;;  %v210_v28 = vld [vmem:[%s329_s0 + $0xc] sm:$0xff]   ;;  %p218_p0 = scmp.ne.s32.totalorder %s177_s20, %s217_s21  ;;  %p222_p1 = scmp.lt.s32.totalorder %s177_s20, %s177_s20 }
   0x7   :  { %v185_v14 = vld [vmem:[%s329_s0] ss:$20 sps:$4 sm:$0xff]   ;;  %v190_v18 = vunpack.c.0.s8 %v208_v15  ;;  %v191_v22 = vunpack.c.1.s8 %v208_v15  ;;  %v194_v25 = vunpack.c.2.s8 %v208_v15  ;;  %v195_v32 = vunpack.c.3.s8 %v208_v15  ;;  %v28_v53 = vld [vmem:[%s329_s0 + $0x18] sm:$0x1]  ;;  %p223_p2 = scmp.lt.s32.totalorder %s221_s22, %s217_s21 }
   0x8   :  { %v186_v16 = vunpack.c.0.s8 %v185_v14  ;;  %v187_v17 = vunpack.c.1.s8 %v185_v14  ;;  %v198_v36 = vunpack.c.0.s8 %v210_v28  ;;  %v199_v42 = vunpack.c.1.s8 %v210_v28 }
   0x9   :  { %v44_v24 = vcvt.s32.f32 %v190_v18  ;;  %v45_v30 = vcvt.s32.f32 %v191_v22  ;;  %v46_v35 = vcvt.s32.f32 %v194_v25  ;;  %v47_v41 = vcvt.s32.f32 %v195_v32  ;;  %p224_p3 = por %p223_p2, %p222_p1 }
   0xa   :  { %95 = vperm.xlu1 %216, %v60_v5   ;;  %90 = vperm.xlu0 %215, %v59_v6   ;;  %v42_v21 = vcvt.s32.f32 %v186_v16  ;;  %v43_v23 = vcvt.s32.f32 %v187_v17  ;;  %v48_v45 = vcvt.s32.f32 %v198_v36  ;;  %v202_v46 = vunpack.c.2.s8 %v210_v28 }
   0xb   :  { %v203_v49 = vunpack.c.3.s8 %v210_v28  ;;  %v49_v52 = vcvt.s32.f32 %v199_v42  ;;  %v206_v57 = vunpack.c.2.s8 %v185_v14  ;;  %v207_v63 = vunpack.c.3.s8 %v185_v14  ;;  %p225_p4 = pnand %p224_p3, %p218_p0 }
   0xc   :  { %v50_v56 = vcvt.s32.f32 %v202_v46  ;;  %v41_v0 = vunpack.c.0.s8 %v28_v53 }
   0xd   :  { %v51_v59 = vcvt.s32.f32 %v203_v49  ;;  %v52_v3 = vcvt.s32.f32 %v206_v57 }
   0xe   :  { %105 = vperm.xlu1 %216, %v62_v7   ;;  %100 = vperm.xlu0 %215, %v61_v8   ;;  %v53_v7 = vcvt.s32.f32 %v207_v63  ;;  %v54_v8 = vcvt.s32.f32 %v41_v0 }
  0x12   :  { %115 = vperm.xlu1 %216, %v64_v9   ;;  %110 = vperm.xlu0 %215, %v63_v10  }
  0x16   :  { %125 = vperm.xlu1 %216, %v66_v11   ;;  %120 = vperm.xlu0 %215, %v65_v12  }
  0x1a   :  { %130 = vperm.xlu0 %215, %v67_v13  }
  0x81   :  { %v81_v19 = vpop.permute.xlu1 %80  ;;  %v71_v20 = vpop.permute.xlu0 %70 }
  0x82   :  { %v133_v29 = vmul.f32 %v71_v20, %v42_v21  ;;  %v135_v33 = vmul.f32 %v81_v19, %v44_v24  ;;  %v167_v24 = vstv %s331_s2 }
  0x85   :  { %v86_v26 = vpop.permute.xlu1 %85  ;;  %v76_v27 = vpop.permute.xlu0 %75 }
  0x86   :  { %v134_v31 = vmul.f32 %v76_v27, %v43_v23  ;;  %v136_v39 = vmul.f32 %v86_v26, %v45_v30 }
  0x88   :  { %v146_v34 = vadd.f32 %v134_v31, %v133_v29 }
  0x89   :  { %v96_v37 = vpop.permute.xlu1 %95  ;;  %v91_v38 = vpop.permute.xlu0 %90 }
  0x8a   :  { %v147_v40 = vadd.f32 %v146_v34, %v135_v33  ;;  %v137_v43 = vmul.f32 %v91_v38, %v46_v35  ;;  %v138_v50 = vmul.f32 %v96_v37, %v47_v41 }
  0x8c   :  { %v148_v44 = vadd.f32 %v147_v40, %v136_v39 }
  0x8d   :  { %v106_v47 = vpop.permute.xlu1 %105  ;;  %v101_v48 = vpop.permute.xlu0 %100 }
  0x8e   :  { %v149_v51 = vadd.f32 %v148_v44, %v137_v43  ;;  %v139_v54 = vmul.f32 %v101_v48, %v48_v45  ;;  %v140_v61 = vmul.f32 %v106_v47, %v49_v52 }
  0x90   :  { %v150_v55 = vadd.f32 %v149_v51, %v138_v50 }
  0x91   :  { %v116_v58 = vpop.permute.xlu1 %115  ;;  %v111_v60 = vpop.permute.xlu0 %110 }
  0x92   :  { %v151_v62 = vadd.f32 %v150_v55, %v139_v54  ;;  %v141_v1 = vmul.f32 %v111_v60, %v50_v56  ;;  %v142_v5 = vmul.f32 %v116_v58, %v51_v59 }
  0x94   :  { %v152_v2 = vadd.f32 %v151_v62, %v140_v61 }
  0x95   :  { %v121_v4 = vpop.permute.xlu0 %120  ;;  %v126_v9 = vpop.permute.xlu1 %125 }
  0x96   :  { %v153_v6 = vadd.f32 %v152_v2, %v141_v1  ;;  %v143_v10 = vmul.f32 %v121_v4, %v52_v3  ;;  %v144_v13 = vmul.f32 %v126_v9, %v53_v7 }
  0x98   :  { %v154_v11 = vadd.f32 %v153_v6, %v142_v5 }
  0x99   :  { %v131_v12 = vpop.permute.xlu0 %130 }
  0x9a   :  { %v155_v15 = vadd.f32 %v154_v11, %v143_v10  ;;  %v145_v16 = vmul.f32 %v131_v12, %v54_v8 }
  0x9c   :  { %v156_v17 = vadd.f32 %v155_v15, %v144_v13  ;;  %v158_v18 = vsel %vm157_vm0, %v145_v16, 0.0 }
  0x9e   :  { %v159_v14 = vadd.f32 %v158_v18, %v156_v17 }
  0xa0   :  { %v160_v19 = vrot.slane %v159_v14, 4 }
  0xa2   :  { %v161_v20 = vadd.f32 %v160_v19, %v159_v14 }
  0xa4   :  { %v162_v21 = vrot.slane %v161_v20, 2 }
  0xa6   :  { %v163_v22 = vadd.f32 %v162_v21, %v161_v20 }
  0xa8   :  { %v164_v23 = vrot.slane %v163_v22, 1 }
  0xaa   :  { %v165_v25 = vadd.f32 %v164_v23, %v163_v22 }
  0xac   :  { %v168_v26 = vadd.f32 %v167_v24, %v165_v25 }
  0xae   :  { %169 = vst [vmem:[#allocation3] sm:$0x1] %v168_v26 }
  0xaf   :  { %228 = shalt.err (!%p225_p4)
}
  0xb0   :  { %s229_s25 = scalar_lea.hbm %s332_s3, 16 }
  0xb1   :  { %p230_p5 = scmp.ne.s32.totalorder %s332_s3, %s229_s25  ;;  %p233_p6 = scmp.lt.u32.totalorder %s229_s25, %s332_s3 }
  0xb3   :  { %p235_p7 = pnand %p233_p6, %p230_p5 }
  0xb5   :  { %238 = shalt.err (!%p235_p7)
}
  0xb6   :  { %179 = dma.vmem_to_hbm [thread:$0]  %s177_s20, 16, %s332_s3, [#allocation4]  }
  0xb7   :  { %239 = dma.done.wait [#allocation4], 16  }
  0xb8   :  { %240 = vsyncadd [#allocation4], 4294967280 }
  0xb9   :  { %183 = vsyncpa [#allocation4], 1 }

</bundles_post_ra>
